<compile_context>
chip_gen: v7x
topology: tpu7x:2x2x1
jax: 0.10.0
libtpu: 0.0.40
codegen_flags: <defaults>
</compile_context>

<pallas_src>
import functools

import jax
import jax.numpy as jnp
from jax.experimental import pallas as pl
from jax.experimental.pallas import tpu as pltpu

LANE = 128
SUBLANE = 8


def _round_up(n, m):
    return ((n + m - 1) // m) * m


def fnn_kernel(x_ref,
               w1_ref, b1_ref,
               w2_ref, b2_ref,
               w3_ref, b3_ref,
               w4_ref, b4_ref,
               w5_ref, b5_ref,
               o_ref):
    # Whole MLP resident in VMEM for one batch tile: 5 MXU matmuls with f32
    # accumulation, f32 bias adds + ReLUs on the VPU (v5e-safe: no bf16 VPU).
    h = x_ref[...]

    h = jnp.dot(h, w1_ref[...], preferred_element_type=jnp.float32) + b1_ref[...]
    h = jnp.maximum(h, 0.0)

    h = jnp.dot(h, w2_ref[...], preferred_element_type=jnp.float32) + b2_ref[...]
    h = jnp.maximum(h, 0.0)

    h = jnp.dot(h, w3_ref[...], preferred_element_type=jnp.float32) + b3_ref[...]
    h = jnp.maximum(h, 0.0)

    h = jnp.dot(h, w4_ref[...], preferred_element_type=jnp.float32) + b4_ref[...]
    h = jnp.maximum(h, 0.0)

    h = jnp.dot(h, w5_ref[...], preferred_element_type=jnp.float32) + b5_ref[...]

    o_ref[...] = h.astype(o_ref.dtype)


def prepare_params(params):
    """One-time parameter prep (hoisted out of the per-call hot path).

    params: list of (W, b) in PyTorch layout, W: (out, in), b: (out,).
    Returns:
      flat: [W1', b1', ..., W5', b5'] with
        W1': (in_features, out_pad1)   -- input (K) axis NOT padded
        Wi': (out_pad_{i-1}, out_pad_i) for i > 1
        bi': (1, out_pad_i)
      layer_dims: tuple of the true (in, out) dims per layer (for cost est.).
    Zero padding is exact: padded input columns hold zero activations (bias 0,
    ReLU(0)=0) against zero weight rows; padded output columns get bias 0.
    """
    flat = []
    layer_dims = []
    in_p = None
    for li, (W, b) in enumerate(params):
        W = jnp.asarray(W, jnp.float32)
        b = jnp.asarray(b, jnp.float32)
        out_f, in_f = W.shape
        layer_dims.append((in_f, out_f))
        if li == 0:
            in_p = in_f                      # keep the network input width as-is
        out_p = _round_up(out_f, LANE)       # pad only the output (lane) axis
        Wp = jnp.zeros((in_p, out_p), jnp.float32).at[:in_f, :out_f].set(W.T)
        bp = jnp.zeros((1, out_p), jnp.float32).at[:, :out_f].set(b)
        flat.append(Wp)
        flat.append(bp)
        in_p = out_p                         # next layer consumes padded acts
    return flat, tuple(layer_dims)


def fnn_forward(x, flat_params, *, out_features, layer_dims):
    """x: (batch, in_features) f32. flat_params: output of prepare_params."""
    batch, in_features = x.shape
    assert flat_params[0].shape[0] == in_features
    out_pad = flat_params[-1].shape[1]       # padded output width of last layer

    # Batch tiling: no row padding, no extra copy of x. Ragged last block is
    # safe (rows independent; OOB rows never written back).
    if batch <= 64:
        tm = batch                           # one block == full batch dim (legal)
    else:
        # >= 2 balanced tiles so the "parallel" axis can use both v7x TCs,
        # capped at 512 rows to amortize per-step (~0.35us) overhead.
        tm = min(512, _round_up(pl.cdiv(batch, 2), SUBLANE))
    grid = (pl.cdiv(batch, tm),)

    x_spec = pl.BlockSpec((tm, in_features), lambda i: (i, 0))
    out_spec = pl.BlockSpec((tm, out_pad), lambda i: (i, 0))
    # Weights/biases: one full-array block, constant index_map -> stay resident
    # in VMEM across all batch-grid iterations.
    param_specs = [pl.BlockSpec(p.shape, lambda i: (0, 0)) for p in flat_params]

    # Real flop count (true layer dims); bytes = what is actually streamed.
    flops = 2 * batch * sum(din * dout for din, dout in layer_dims)
    bytes_accessed = x.size * 4 + batch * out_pad * 4
    for p in flat_params:
        bytes_accessed += p.size * 4

    out = pl.pallas_call(
        fnn_kernel,
        out_shape=jax.ShapeDtypeStruct((batch, out_pad), jnp.float32),
        grid=grid,
        in_specs=[x_spec] + param_specs,
        out_specs=out_spec,
        compiler_params=pltpu.CompilerParams(
            dimension_semantics=("parallel",)),
        cost_estimate=pl.CostEstimate(
            flops=flops, transcendentals=0, bytes_accessed=bytes_accessed),
    )(x, *flat_params)

    # Slice the real output columns back out (rows were never padded).
    return out[:, :out_features]


def _init_linear(key, in_features, out_features):
    # Deterministic init mimicking PyTorch's uniform(-1/sqrt(in), 1/sqrt(in)).
    kw, kb = jax.random.split(key)
    bound = 1.0 / (in_features ** 0.5)
    W = jax.random.uniform(kw, (out_features, in_features), jnp.float32,
                           minval=-bound, maxval=bound)
    b = jax.random.uniform(kb, (out_features,), jnp.float32,
                           minval=-bound, maxval=bound)
    return W, b


def _reference_forward(x, params):
    h = x
    n = len(params)
    for i, (W, b) in enumerate(params):
        h = h @ W.T + b
        if i < n - 1:
            h = jnp.maximum(h, 0.0)
    return h


if __name__ == "__main__":
    # FNN(input_size=32, h1=64, h2=64, h3=32, h4=32, output_size=16), batch=8
    input_size, h1, h2, h3, h4, output_size = 32, 64, 64, 32, 32, 16
    batch = 8

    key = jax.random.PRNGKey(0)
    kx, k1, k2, k3, k4, k5 = jax.random.split(key, 6)

    x = jax.random.normal(kx, (batch, input_size), jnp.float32)

    dims = [(input_size, h1), (h1, h2), (h2, h3), (h3, h4), (h4, output_size)]
    keys = [k1, k2, k3, k4, k5]
    params = [_init_linear(k, din, dout) for k, (din, dout) in zip(keys, dims)]

    # One-time parameter preparation (transpose + output-axis pad), outside the
    # hot path.
    flat_params, layer_dims = prepare_params(params)
    flat_params = jax.block_until_ready(flat_params)

    # Jitted hot-path wrapper: pallas_call + output column slice only.
    fwd = jax.jit(functools.partial(
        fnn_forward, out_features=output_size, layer_dims=layer_dims))

    out = fwd(x, flat_params)
    jax.block_until_ready(out)

    ref = _reference_forward(x, params)
    assert out.shape == (batch, output_size)
    assert jnp.allclose(out, ref, atol=1e-4, rtol=1e-4), "mismatch vs reference"

    print("KERNEL_OK")
</pallas_src>

<mosaic_0001>
module attributes {stable_mosaic.version = 11 : i64} {
  func.func @fnn_kernel(%arg0: i32, %arg1: memref<8x32xf32, #tpu.memory_space<vmem>>, %arg2: memref<32x128xf32, #tpu.memory_space<vmem>>, %arg3: memref<1x128xf32, #tpu.memory_space<vmem>>, %arg4: memref<128x128xf32, #tpu.memory_space<vmem>>, %arg5: memref<1x128xf32, #tpu.memory_space<vmem>>, %arg6: memref<128x128xf32, #tpu.memory_space<vmem>>, %arg7: memref<1x128xf32, #tpu.memory_space<vmem>>, %arg8: memref<128x128xf32, #tpu.memory_space<vmem>>, %arg9: memref<1x128xf32, #tpu.memory_space<vmem>>, %arg10: memref<128x128xf32, #tpu.memory_space<vmem>>, %arg11: memref<1x128xf32, #tpu.memory_space<vmem>>, %arg12: memref<8x128xf32, #tpu.memory_space<vmem>>) attributes {dimension_semantics = [#tpu.dimension_semantics<parallel>], iteration_bounds = array<i64: 1>, scalar_prefetch = 0 : i64, scratch_operands = 0 : i64, tpu.core_type = #tpu.core_type<tc>, window_params = [{transform_indices = @transform_0, window_bounds = array<i64: 8, 32>}, {pipeline_mode = #tpu.pipeline_mode<synchronous>, transform_indices = @transform_1, window_bounds = array<i64: 32, 128>}, {pipeline_mode = #tpu.pipeline_mode<synchronous>, transform_indices = @transform_2, window_bounds = array<i64: 1, 128>}, {pipeline_mode = #tpu.pipeline_mode<synchronous>, transform_indices = @transform_3, window_bounds = array<i64: 128, 128>}, {pipeline_mode = #tpu.pipeline_mode<synchronous>, transform_indices = @transform_4, window_bounds = array<i64: 1, 128>}, {pipeline_mode = #tpu.pipeline_mode<synchronous>, transform_indices = @transform_5, window_bounds = array<i64: 128, 128>}, {pipeline_mode = #tpu.pipeline_mode<synchronous>, transform_indices = @transform_6, window_bounds = array<i64: 1, 128>}, {pipeline_mode = #tpu.pipeline_mode<synchronous>, transform_indices = @transform_7, window_bounds = array<i64: 128, 128>}, {pipeline_mode = #tpu.pipeline_mode<synchronous>, transform_indices = @transform_8, window_bounds = array<i64: 1, 128>}, {pipeline_mode = #tpu.pipeline_mode<synchronous>, transform_indices = @transform_9, window_bounds = array<i64: 128, 128>}, {pipeline_mode = #tpu.pipeline_mode<synchronous>, transform_indices = @transform_10, window_bounds = array<i64: 1, 128>}, {transform_indices = @transform_11, window_bounds = array<i64: 8, 128>}]} {
    %c0 = arith.constant 0 : index
    %c0_0 = arith.constant 0 : index
    %0 = vector.load %arg1[%c0, %c0_0] : memref<8x32xf32, #tpu.memory_space<vmem>>, vector<8x32xf32>
    %c0_1 = arith.constant 0 : index
    %c0_2 = arith.constant 0 : index
    %1 = vector.load %arg2[%c0_1, %c0_2] : memref<32x128xf32, #tpu.memory_space<vmem>>, vector<32x128xf32>
    %cst = arith.constant dense<0.000000e+00> : vector<8x128xf32>
    %2 = tpu.matmul %0, %1, %cst {dimension_numbers = #tpu.dot_dimension_numbers<[1], [0], [0], [1], [0, 0, 1, 1], [], []>} : vector<8x32xf32>, vector<32x128xf32>, vector<8x128xf32> -> vector<8x128xf32>
    %c0_3 = arith.constant 0 : index
    %c0_4 = arith.constant 0 : index
    %3 = vector.load %arg3[%c0_3, %c0_4] : memref<1x128xf32, #tpu.memory_space<vmem>>, vector<1x128xf32>
    %4 = vector.broadcast %3 : vector<1x128xf32> to vector<8x128xf32>
    %5 = arith.addf %2, %4 : vector<8x128xf32>
    %cst_5 = arith.constant 0.000000e+00 : f32
    %6 = vector.broadcast %cst_5 : f32 to vector<8x128xf32>
    %7 = arith.maximumf %5, %6 : vector<8x128xf32>
    %c0_6 = arith.constant 0 : index
    %c0_7 = arith.constant 0 : index
    %8 = vector.load %arg4[%c0_6, %c0_7] : memref<128x128xf32, #tpu.memory_space<vmem>>, vector<128x128xf32>
    %cst_8 = arith.constant dense<0.000000e+00> : vector<8x128xf32>
    %9 = tpu.matmul %7, %8, %cst_8 {dimension_numbers = #tpu.dot_dimension_numbers<[1], [0], [0], [1], [0, 0, 1, 1], [], []>} : vector<8x128xf32>, vector<128x128xf32>, vector<8x128xf32> -> vector<8x128xf32>
    %c0_9 = arith.constant 0 : index
    %c0_10 = arith.constant 0 : index
    %10 = vector.load %arg5[%c0_9, %c0_10] : memref<1x128xf32, #tpu.memory_space<vmem>>, vector<1x128xf32>
    %11 = vector.broadcast %10 : vector<1x128xf32> to vector<8x128xf32>
    %12 = arith.addf %9, %11 : vector<8x128xf32>
    %cst_11 = arith.constant 0.000000e+00 : f32
    %13 = vector.broadcast %cst_11 : f32 to vector<8x128xf32>
    %14 = arith.maximumf %12, %13 : vector<8x128xf32>
    %c0_12 = arith.constant 0 : index
    %c0_13 = arith.constant 0 : index
    %15 = vector.load %arg6[%c0_12, %c0_13] : memref<128x128xf32, #tpu.memory_space<vmem>>, vector<128x128xf32>
    %cst_14 = arith.constant dense<0.000000e+00> : vector<8x128xf32>
    %16 = tpu.matmul %14, %15, %cst_14 {dimension_numbers = #tpu.dot_dimension_numbers<[1], [0], [0], [1], [0, 0, 1, 1], [], []>} : vector<8x128xf32>, vector<128x128xf32>, vector<8x128xf32> -> vector<8x128xf32>
    %c0_15 = arith.constant 0 : index
    %c0_16 = arith.constant 0 : index
    %17 = vector.load %arg7[%c0_15, %c0_16] : memref<1x128xf32, #tpu.memory_space<vmem>>, vector<1x128xf32>
    %18 = vector.broadcast %17 : vector<1x128xf32> to vector<8x128xf32>
    %19 = arith.addf %16, %18 : vector<8x128xf32>
    %cst_17 = arith.constant 0.000000e+00 : f32
    %20 = vector.broadcast %cst_17 : f32 to vector<8x128xf32>
    %21 = arith.maximumf %19, %20 : vector<8x128xf32>
    %c0_18 = arith.constant 0 : index
    %c0_19 = arith.constant 0 : index
    %22 = vector.load %arg8[%c0_18, %c0_19] : memref<128x128xf32, #tpu.memory_space<vmem>>, vector<128x128xf32>
    %cst_20 = arith.constant dense<0.000000e+00> : vector<8x128xf32>
    %23 = tpu.matmul %21, %22, %cst_20 {dimension_numbers = #tpu.dot_dimension_numbers<[1], [0], [0], [1], [0, 0, 1, 1], [], []>} : vector<8x128xf32>, vector<128x128xf32>, vector<8x128xf32> -> vector<8x128xf32>
    %c0_21 = arith.constant 0 : index
    %c0_22 = arith.constant 0 : index
    %24 = vector.load %arg9[%c0_21, %c0_22] : memref<1x128xf32, #tpu.memory_space<vmem>>, vector<1x128xf32>
    %25 = vector.broadcast %24 : vector<1x128xf32> to vector<8x128xf32>
    %26 = arith.addf %23, %25 : vector<8x128xf32>
    %cst_23 = arith.constant 0.000000e+00 : f32
    %27 = vector.broadcast %cst_23 : f32 to vector<8x128xf32>
    %28 = arith.maximumf %26, %27 : vector<8x128xf32>
    %c0_24 = arith.constant 0 : index
    %c0_25 = arith.constant 0 : index
    %29 = vector.load %arg10[%c0_24, %c0_25] : memref<128x128xf32, #tpu.memory_space<vmem>>, vector<128x128xf32>
    %cst_26 = arith.constant dense<0.000000e+00> : vector<8x128xf32>
    %30 = tpu.matmul %28, %29, %cst_26 {dimension_numbers = #tpu.dot_dimension_numbers<[1], [0], [0], [1], [0, 0, 1, 1], [], []>} : vector<8x128xf32>, vector<128x128xf32>, vector<8x128xf32> -> vector<8x128xf32>
    %c0_27 = arith.constant 0 : index
    %c0_28 = arith.constant 0 : index
    %31 = vector.load %arg11[%c0_27, %c0_28] : memref<1x128xf32, #tpu.memory_space<vmem>>, vector<1x128xf32>
    %32 = vector.broadcast %31 : vector<1x128xf32> to vector<8x128xf32>
    %33 = arith.addf %30, %32 : vector<8x128xf32>
    %c0_29 = arith.constant 0 : index
    %c0_30 = arith.constant 0 : index
    %34 = vector.load %arg12[%c0_29, %c0_30] : memref<8x128xf32, #tpu.memory_space<vmem>>, vector<8x128xf32>
    tpu.vector_store %arg12[%c0_29, %c0_30], %33 {strides = array<i32>} : memref<8x128xf32, #tpu.memory_space<vmem>>, vector<8x128xf32>,
    return
  }
  func.func @transform_0(%arg0: i32) -> (i32, i32) {
    %c0_i32 = arith.constant 0 : i32
    %c0_i32_0 = arith.constant 0 : i32
    return %arg0, %c0_i32 : i32, i32
  }
  func.func @transform_1(%arg0: i32) -> (i32, i32) {
    %c0_i32 = arith.constant 0 : i32
    %c0_i32_0 = arith.constant 0 : i32
    %c0_i32_1 = arith.constant 0 : i32
    return %c0_i32, %c0_i32_0 : i32, i32
  }
  func.func @transform_2(%arg0: i32) -> (i32, i32) {
    %c0_i32 = arith.constant 0 : i32
    %c0_i32_0 = arith.constant 0 : i32
    %c0_i32_1 = arith.constant 0 : i32
    return %c0_i32, %c0_i32_0 : i32, i32
  }
  func.func @transform_3(%arg0: i32) -> (i32, i32) {
    %c0_i32 = arith.constant 0 : i32
    %c0_i32_0 = arith.constant 0 : i32
    %c0_i32_1 = arith.constant 0 : i32
    return %c0_i32, %c0_i32_0 : i32, i32
  }
  func.func @transform_4(%arg0: i32) -> (i32, i32) {
    %c0_i32 = arith.constant 0 : i32
    %c0_i32_0 = arith.constant 0 : i32
    %c0_i32_1 = arith.constant 0 : i32
    return %c0_i32, %c0_i32_0 : i32, i32
  }
  func.func @transform_5(%arg0: i32) -> (i32, i32) {
    %c0_i32 = arith.constant 0 : i32
    %c0_i32_0 = arith.constant 0 : i32
    %c0_i32_1 = arith.constant 0 : i32
    return %c0_i32, %c0_i32_0 : i32, i32
  }
  func.func @transform_6(%arg0: i32) -> (i32, i32) {
    %c0_i32 = arith.constant 0 : i32
    %c0_i32_0 = arith.constant 0 : i32
    %c0_i32_1 = arith.constant 0 : i32
    return %c0_i32, %c0_i32_0 : i32, i32
  }
  func.func @transform_7(%arg0: i32) -> (i32, i32) {
    %c0_i32 = arith.constant 0 : i32
    %c0_i32_0 = arith.constant 0 : i32
    %c0_i32_1 = arith.constant 0 : i32
    return %c0_i32, %c0_i32_0 : i32, i32
  }
  func.func @transform_8(%arg0: i32) -> (i32, i32) {
    %c0_i32 = arith.constant 0 : i32
    %c0_i32_0 = arith.constant 0 : i32
    %c0_i32_1 = arith.constant 0 : i32
    return %c0_i32, %c0_i32_0 : i32, i32
  }
  func.func @transform_9(%arg0: i32) -> (i32, i32) {
    %c0_i32 = arith.constant 0 : i32
    %c0_i32_0 = arith.constant 0 : i32
    %c0_i32_1 = arith.constant 0 : i32
    return %c0_i32, %c0_i32_0 : i32, i32
  }
  func.func @transform_10(%arg0: i32) -> (i32, i32) {
    %c0_i32 = arith.constant 0 : i32
    %c0_i32_0 = arith.constant 0 : i32
    %c0_i32_1 = arith.constant 0 : i32
    return %c0_i32, %c0_i32_0 : i32, i32
  }
  func.func @transform_11(%arg0: i32) -> (i32, i32) {
    %c0_i32 = arith.constant 0 : i32
    %c0_i32_0 = arith.constant 0 : i32
    return %arg0, %c0_i32 : i32, i32
  }
}

</mosaic_0001>

<bundles_post_ra>
// kernel: fnn_forward.1
= control target key start
LH: loop header
LB: loop body
LE: loop exit
PB: predicated region body
PF: predicated region fallthrough
CT: control target
= control target key end

     0   :  { %16 = vsyncpa [#allocation3], 0  ;;  %s1338_s0 = inlined_call_operand.hbm [shape: f32[8,32], index: 0, kind: input, shape index: {}]   ;;  %s1339_s1 = inlined_call_operand.hbm [shape: f32[32,128], index: 1, kind: input, shape index: {}]   ;;  %s1340_s2 = inlined_call_operand.vmem [shape: f32[1,128], index: 2, kind: input, shape index: {}]   ;;  %s1341_s3 = inlined_call_operand.hbm [shape: f32[128,128], index: 3, kind: input, shape index: {}]   ;;  %s1342_s4 = inlined_call_operand.vmem [shape: f32[1,128], index: 4, kind: input, shape index: {}]   ;;  %s1343_s5 = inlined_call_operand.hbm [shape: f32[128,128], index: 5, kind: input, shape index: {}]   ;;  %s1344_s6 = inlined_call_operand.vmem [shape: f32[1,128], index: 6, kind: input, shape index: {}]   ;;  %s1345_s7 = inlined_call_operand.hbm [shape: f32[128,128], index: 7, kind: input, shape index: {}]   ;;  %s1346_s8 = inlined_call_operand.vmem [shape: f32[1,128], index: 8, kind: input, shape index: {}]   ;;  %s1347_s9 = inlined_call_operand.hbm [shape: f32[128,128], index: 9, kind: input, shape index: {}]   ;;  %s1348_s10 = inlined_call_operand.vmem [shape: f32[1,128], index: 10, kind: input, shape index: {}]   ;;  %s1349_s11 = inlined_call_operand.hbm [shape: f32[8,128], index: 11, kind: output, shape index: {}]  }
   0x1   :  { %17 = vsyncpa [#allocation6], 0 }
   0x2   :  { %18 = vsyncpa [#allocation9], 0 }
   0x3   :  { %19 = vsyncpa [#allocation12], 0 }
   0x4   :  { %20 = vsyncpa [#allocation4], 0  ;;  %s1108_s17 = smov [#allocation5]   ;;  %s944_s21 = scalar_lea.hbm %s1339_s1, 512 }
   0x5   :  { %s36_s18 = sshll.u32 %s1108_s17, 4  ;;  %p945_p0 = scmp.ne.s32.totalorder %s1339_s1, %s944_s21  ;;  %s37_s18 = int_to_ptr.vmem [resolvable:$true] %s36_s18 }
   0x6   :  { %p948_p1 = scmp.lt.u32.totalorder %s944_s21, %s1339_s1 }
   0x8   :  { %p950_p2 = pnand %p948_p1, %p945_p0 }
   0xa   :  { %953 = shalt.err (!%p950_p2)
}
   0xb   :  { %s954_s26 = scalar_lea.vmem %s37_s18, 512  ;;  %p959_p4 = scmp.lt.s32.totalorder %s37_s18, %s37_s18 }
   0xc   :  { %p955_p3 = scmp.ne.s32.totalorder %s37_s18, %s954_s26  ;;  %p960_p5 = scmp.lt.s32.totalorder %s954_s26, %s954_s26 }
   0xe   :  { %p961_p6 = por %p960_p5, %p959_p4 }
  0x10   :  { %p962_p7 = pnand %p961_p6, %p955_p3 }
  0x12   :  { %965 = shalt.err (!%p962_p7)
}
  0x13   :  { %s1109_s27 = smov 128   ;;  %s1110_s28 = smov 8  }
  0x14   :  { %42 = dma.hbm_to_vmem [thread:$0]  %s1339_s1, 512, %s37_s18, [#allocation6], %s1109_s27, %s1109_s27, %s1110_s28  }
  0x15   :  { %s1111_s12 = smov [#allocation8]   ;;  %s1112_s14 = smov [#allocation2]  }
  0x16   :  { %s64_s13 = sshll.u32 %s1111_s12, 4  ;;  %s27_s15 = sshll.u32 %s1112_s14, 4  ;;  %s65_s13 = int_to_ptr.vmem [resolvable:$true] %s64_s13  ;;  %s28_s15 = int_to_ptr.vmem [resolvable:$true] %s27_s15 }
  0x17   :  { %s966_s19 = scalar_lea.hbm %s1343_s5, 2048 }
  0x18   :  { %p967_p8 = scmp.ne.s32.totalorder %s1343_s5, %s966_s19  ;;  %p970_p9 = scmp.lt.u32.totalorder %s966_s19, %s1343_s5 }
  0x1a   :  { %p972_p10 = pnand %p970_p9, %p967_p8 }
  0x1c   :  { %975 = shalt.err (!%p972_p10)
}
  0x1d   :  { %s976_s1 = scalar_lea.vmem %s65_s13, 2048  ;;  %p981_p12 = scmp.lt.s32.totalorder %s65_s13, %s65_s13 }
  0x1e   :  { %p977_p11 = scmp.ne.s32.totalorder %s65_s13, %s976_s1  ;;  %p982_p13 = scmp.lt.s32.totalorder %s976_s1, %s976_s1 }
  0x20   :  { %p983_p0 = por %p982_p13, %p981_p12 }
  0x22   :  { %p984_p1 = pnand %p983_p0, %p977_p11 }
  0x24   :  { %987 = shalt.err (!%p984_p1)
}
  0x25   :  { %70 = dma.hbm_to_vmem [thread:$0]  %s1343_s5, 2048, %s65_s13, [#allocation9], %s1109_s27, %s1109_s27, %s1110_s28  }
  0x26   :  { %s988_s29 = scalar_lea.hbm %s1338_s0, 128 }
  0x27   :  { %p989_p2 = scmp.ne.s32.totalorder %s1338_s0, %s988_s29  ;;  %p992_p3 = scmp.lt.u32.totalorder %s988_s29, %s1338_s0 }
  0x29   :  { %p994_p4 = pnand %p992_p3, %p989_p2 }
  0x2b   :  { %997 = shalt.err (!%p994_p4)
}
  0x2c   :  { %s998_s17 = scalar_lea.vmem %s28_s15, 128  ;;  %p1003_p6 = scmp.lt.s32.totalorder %s28_s15, %s28_s15 }
  0x2d   :  { %p999_p5 = scmp.ne.s32.totalorder %s28_s15, %s998_s17  ;;  %p1004_p7 = scmp.lt.s32.totalorder %s998_s17, %s998_s17 }
  0x2f   :  { %p1005_p8 = por %p1004_p7, %p1003_p6 }
  0x31   :  { %p1006_p9 = pnand %p1005_p8, %p999_p5 }
  0x33   :  { %1009 = shalt.err (!%p1006_p9)
}
  0x34   :  { %30 = dma.hbm_to_vmem [thread:$0]  %s1338_s0, 128, %s28_s15, [#allocation3]  }
  0x35   :  { %s1113_s19 = smov [#allocation7]   ;;  %s1114_s21 = smov [#allocation10]  }
  0x36   :  { %s50_s20 = sshll.u32 %s1113_s19, 4  ;;  %s78_s22 = sshll.u32 %s1114_s21, 4  ;;  %s51_s20 = int_to_ptr.vmem [resolvable:$true] %s50_s20  ;;  %s79_s22 = int_to_ptr.vmem [resolvable:$true] %s78_s22 }
  0x37   :  { %s1010_s18 = scalar_lea.hbm %s1341_s3, 2048 }
  0x38   :  { %p1011_p10 = scmp.ne.s32.totalorder %s1341_s3, %s1010_s18  ;;  %p1014_p11 = scmp.lt.u32.totalorder %s1010_s18, %s1341_s3 }
  0x3a   :  { %p1016_p12 = pnand %p1014_p11, %p1011_p10 }
  0x3c   :  { %1019 = shalt.err (!%p1016_p12)
}
  0x3d   :  { %s1020_s0 = scalar_lea.vmem %s51_s20, 2048  ;;  %p1025_p0 = scmp.lt.s32.totalorder %s51_s20, %s51_s20 }
  0x3e   :  { %p1021_p13 = scmp.ne.s32.totalorder %s51_s20, %s1020_s0  ;;  %p1026_p1 = scmp.lt.s32.totalorder %s1020_s0, %s1020_s0 }
  0x40   :  { %p1027_p2 = por %p1026_p1, %p1025_p0 }
  0x42   :  { %p1028_p3 = pnand %p1027_p2, %p1021_p13 }
  0x44   :  { %1031 = shalt.err (!%p1028_p3)
}
  0x45   :  { %56 = dma.hbm_to_vmem [thread:$0]  %s1341_s3, 2048, %s51_s20, [#allocation6], %s1109_s27, %s1109_s27, %s1110_s28  }
  0x46   :  { %s1032_s16 = scalar_lea.hbm %s1345_s7, 2048 }
  0x47   :  { %p1033_p4 = scmp.ne.s32.totalorder %s1345_s7, %s1032_s16  ;;  %p1036_p5 = scmp.lt.u32.totalorder %s1032_s16, %s1345_s7 }
  0x49   :  { %p1038_p6 = pnand %p1036_p5, %p1033_p4 }
  0x4b   :  { %1041 = shalt.err (!%p1038_p6)
}
  0x4c   :  { %s1042_s21 = scalar_lea.vmem %s79_s22, 2048  ;;  %p1047_p8 = scmp.lt.s32.totalorder %s79_s22, %s79_s22 }
  0x4d   :  { %p1043_p7 = scmp.ne.s32.totalorder %s79_s22, %s1042_s21  ;;  %p1048_p9 = scmp.lt.s32.totalorder %s1042_s21, %s1042_s21 }
  0x4f   :  { %p1049_p10 = por %p1048_p9, %p1047_p8 }
  0x51   :  { %p1050_p11 = pnand %p1049_p10, %p1043_p7 }
  0x53   :  { %1053 = shalt.err (!%p1050_p11)
}
  0x54   :  { %84 = dma.hbm_to_vmem [thread:$0]  %s1345_s7, 2048, %s79_s22, [#allocation9], %s1109_s27, %s1109_s27, %s1110_s28  }
  0x55   :  { %s1115_s23 = smov [#allocation11]   ;;  %s1054_s25 = scalar_lea.hbm %s1347_s9, 2048 }
  0x56   :  { %s92_s1 = sshll.u32 %s1115_s23, 4  ;;  %p1055_p12 = scmp.ne.s32.totalorder %s1347_s9, %s1054_s25  ;;  %s93_s1 = int_to_ptr.vmem [resolvable:$true] %s92_s1 }
  0x57   :  { %p1058_p13 = scmp.lt.u32.totalorder %s1054_s25, %s1347_s9 }
  0x59   :  { %p1060_p0 = pnand %p1058_p13, %p1055_p12 }
  0x5b   :  { %1063 = shalt.err (!%p1060_p0)
}
  0x5c   :  { %s1064_s30 = scalar_lea.vmem %s93_s1, 2048  ;;  %p1069_p2 = scmp.lt.s32.totalorder %s93_s1, %s93_s1 }
  0x5d   :  { %p1065_p1 = scmp.ne.s32.totalorder %s93_s1, %s1064_s30  ;;  %p1070_p3 = scmp.lt.s32.totalorder %s1064_s30, %s1064_s30 }
  0x5f   :  { %p1071_p4 = por %p1070_p3, %p1069_p2 }
  0x61   :  { %p1072_p5 = pnand %p1071_p4, %p1065_p1 }
  0x63   :  { %1075 = shalt.err (!%p1072_p5)
}
  0x64   :  { %98 = dma.hbm_to_vmem [thread:$0]  %s1347_s9, 2048, %s93_s1, [#allocation12], %s1109_s27, %s1109_s27, %s1110_s28  }
  0x65   :  { %1098 = dma.done.wait [#allocation3], 128  }
  0x66   :  { %1099 = vsyncadd [#allocation3], 4294967168 }
  0x67   :  { %1100 = dma.done.wait [#allocation6], 2560  }
  0x68   :  { %1101 = vsyncadd [#allocation6], 4294964736 }
  0x69   :  { %1102 = dma.done.wait [#allocation9], 4096  }
  0x6a   :  { %1103 = vsyncadd [#allocation9], 4294963200 }
  0x6b   :  { %1104 = dma.done.wait [#allocation12], 2048  }
  0x6c   :  { %1105 = vsyncadd [#allocation12], 4294965248  ;;  %v1116_v0 = vmov 0.0|0.0   ;;  %vm1117_vm0 = vmmov 0   ;;  %v1118_v1 = vmov 0.0   ;;  %v120_v2 = vld [vmem:[#allocation5] sm:$0xff] }
  0x6d   :  { %830 = vmatprep.subr.bf16.mxu0 %v1116_v0  ;;  %687 = vmatprep.mubr.msk.f32.mxu0 %vm1117_vm0, %v1118_v1  ;;  %v121_v3 = vld [vmem:[#allocation5 + $0x8] sm:$0xff]  ;;  %v122_v4 = vld [vmem:[#allocation5 + $0x10] sm:$0xff]  ;;  %v123_v6 = vld [vmem:[#allocation5 + $0x18] sm:$0xff]  ;;  %vm131_vm1 = vcmask 261120   ;;  %s1119_s5 = smov [#allocation13]  }
  0x6e   :  { %836 = vmatprep.subr.bf16.mxu1 %v1116_v0  ;;  %722 = vmatprep.mubr.msk.f32.mxu1 %vm1117_vm0, %v1118_v1  ;;  %v831_v5 = vpack.c.bf16 %v121_v3, %v120_v2  ;;  %v206_v7 = vld [vmem:[#allocation7] sm:$0xff]  ;;  %v207_v8 = vld [vmem:[#allocation7 + $0x8] sm:$0xff]  ;;  %v208_v9 = vld [vmem:[#allocation7 + $0x10] sm:$0xff]  ;;  %v834_v11 = vpack.c.bf16 %v123_v6, %v122_v4  ;;  %s588_s13 = sshll.u32 %s1119_s5, 4  ;;  %s589_s13 = int_to_ptr.vmem [resolvable:$true] %s588_s13 }
  0x6f   :  { %v209_v10 = vld [vmem:[#allocation7 + $0x18] sm:$0xff]  ;;  %v837_v12 = vpack.c.bf16 %v207_v8, %v206_v7  ;;  %v210_v14 = vld [vmem:[#allocation7 + $0x20] sm:$0xff]  ;;  %v211_v15 = vld [vmem:[#allocation7 + $0x28] sm:$0xff]  ;;  %s1076_s19 = scalar_lea.vmem %s589_s13, 128  ;;  %p1081_p7 = scmp.lt.s32.totalorder %s589_s13, %s589_s13 }
  0x70   :  { %832 = vmatpush3.bf16.msra.mxu0 %v831_v5  ;;  %v840_v13 = vpack.c.bf16 %v209_v10, %v208_v9  ;;  %v119_v16 = vld [vmem:[#allocation2] sm:$0xff]  ;;  %v843_v17 = vpack.c.bf16 %v211_v15, %v210_v14  ;;  %v212_v18 = vld [vmem:[#allocation7 + $0x30] sm:$0xff]  ;;  %v214_v21 = vld [vmem:[#allocation7 + $0x40] sm:$0xff]  ;;  %p1077_p6 = scmp.ne.s32.totalorder %s589_s13, %s1076_s19  ;;  %p1082_p8 = scmp.lt.s32.totalorder %s1076_s19, %s1076_s19 }
  0x71   :  { %833 = vmatprep.subr.bf16.mxu0 %v1116_v0  ;;  %838 = vmatpush3.bf16.msra.mxu1 %v837_v12  ;;  %v213_v19 = vld [vmem:[#allocation7 + $0x38] sm:$0xff]  ;;  %v215_v22 = vld [vmem:[#allocation7 + $0x48] sm:$0xff]  ;;  %v216_v24 = vld [vmem:[#allocation7 + $0x50] sm:$0xff] }
  0x72   :  { %839 = vmatprep.subr.bf16.mxu1 %v1116_v0  ;;  %v846_v20 = vpack.c.bf16 %v213_v19, %v212_v18  ;;  %v849_v23 = vpack.c.bf16 %v215_v22, %v214_v21  ;;  %v217_v25 = vld [vmem:[#allocation7 + $0x58] sm:$0xff]  ;;  %v218_v27 = vld [vmem:[#allocation7 + $0x60] sm:$0xff]  ;;  %v219_v28 = vld [vmem:[#allocation7 + $0x68] sm:$0xff]  ;;  %p1083_p9 = por %p1082_p8, %p1081_p7 }
  0x73   :  { %v852_v26 = vpack.c.bf16 %v217_v25, %v216_v24  ;;  %v855_v29 = vpack.c.bf16 %v219_v28, %v218_v27  ;;  %v220_v30 = vld [vmem:[#allocation7 + $0x70] sm:$0xff]  ;;  %v221_v31 = vld [vmem:[#allocation7 + $0x78] sm:$0xff]  ;;  %v300_v33 = vld [vmem:[#allocation8] sm:$0xff] }
  0x74   :  { %835 = vmatpush3.bf16.msra.mxu0 %v834_v11  ;;  %v858_v32 = vpack.c.bf16 %v221_v31, %v220_v30  ;;  %v301_v34 = vld [vmem:[#allocation8 + $0x8] sm:$0xff]  ;;  %v302_v35 = vld [vmem:[#allocation8 + $0x10] sm:$0xff]  ;;  %v303_v37 = vld [vmem:[#allocation8 + $0x18] sm:$0xff]  ;;  %p1084_p10 = pnand %p1083_p9, %p1077_p6 }
  0x75   :  { %860 = vmatprep.subr.bf16.mxu0 %v1116_v0  ;;  %841 = vmatpush3.bf16.msra.mxu1 %v840_v13  ;;  %v861_v36 = vpack.c.bf16 %v301_v34, %v300_v33  ;;  %v864_v38 = vpack.c.bf16 %v303_v37, %v302_v35  ;;  %v304_v39 = vld [vmem:[#allocation8 + $0x20] sm:$0xff]  ;;  %v305_v40 = vld [vmem:[#allocation8 + $0x28] sm:$0xff]  ;;  %v306_v42 = vld [vmem:[#allocation8 + $0x30] sm:$0xff] }
  0x76   :  { %842 = vmatprep.subr.bf16.mxu1 %v1116_v0  ;;  %v867_v41 = vpack.c.bf16 %v305_v40, %v304_v39  ;;  %v307_v43 = vld [vmem:[#allocation8 + $0x38] sm:$0xff]  ;;  %v308_v45 = vld [vmem:[#allocation8 + $0x40] sm:$0xff]  ;;  %v309_v46 = vld [vmem:[#allocation8 + $0x48] sm:$0xff] }
  0x77   :  { %688 = vmatmul.mubr.msk.f32.vlgmr.msra.gmra.mrb[0].mxu0 %vm131_vm1, %v119_v16  ;;  %v870_v44 = vpack.c.bf16 %v307_v43, %v306_v42  ;;  %v873_v47 = vpack.c.bf16 %v309_v46, %v308_v45  ;;  %v310_v48 = vld [vmem:[#allocation8 + $0x50] sm:$0xff]  ;;  %v311_v49 = vld [vmem:[#allocation8 + $0x58] sm:$0xff]  ;;  %v312_v51 = vld [vmem:[#allocation8 + $0x60] sm:$0xff] }
  0x78   :  { %757 = vmatprep.mubr.msk.f32.mxu0 %vm1117_vm0, %v1118_v1  ;;  %862 = vmatpush3.bf16.msra.mxu0 %v861_v36  ;;  %v876_v50 = vpack.c.bf16 %v311_v49, %v310_v48  ;;  %v313_v52 = vld [vmem:[#allocation8 + $0x68] sm:$0xff]  ;;  %v600_v54 = vld [vmem:[%s1340_s2] ss:$0 sm:$0xff]  ;;  %v314_v59 = vld [vmem:[#allocation8 + $0x70] sm:$0xff] }
  0x79   :  { %844 = vmatpush3.bf16.msra.mxu1 %v843_v17  ;;  %863 = vmatprep.subr.bf16.mxu0 %v1116_v0  ;;  %v879_v53 = vpack.c.bf16 %v313_v52, %v312_v51  ;;  %v315_v60 = vld [vmem:[#allocation8 + $0x78] sm:$0xff]  ;;  %v394_v62 = vld [vmem:[#allocation10] sm:$0xff]  ;;  %v395_v63 = vld [vmem:[#allocation10 + $0x8] sm:$0xff] }
  0x7a   :  { %845 = vmatprep.subr.bf16.mxu1 %v1116_v0  ;;  %v882_v61 = vpack.c.bf16 %v315_v60, %v314_v59  ;;  %v396_v2 = vld [vmem:[#allocation10 + $0x10] sm:$0xff]  ;;  %v885_v3 = vpack.c.bf16 %v395_v63, %v394_v62  ;;  %v397_v4 = vld [vmem:[#allocation10 + $0x18] sm:$0xff]  ;;  %v398_v6 = vld [vmem:[#allocation10 + $0x20] sm:$0xff] }
  0x7b   :  { %v888_v5 = vpack.c.bf16 %v397_v4, %v396_v2  ;;  %v399_v7 = vld [vmem:[#allocation10 + $0x28] sm:$0xff]  ;;  %v400_v9 = vld [vmem:[#allocation10 + $0x30] sm:$0xff]  ;;  %v401_v10 = vld [vmem:[#allocation10 + $0x38] sm:$0xff] }
  0x7c   :  { %865 = vmatpush3.bf16.msra.mxu0 %v864_v38  ;;  %v891_v8 = vpack.c.bf16 %v399_v7, %v398_v6  ;;  %v894_v11 = vpack.c.bf16 %v401_v10, %v400_v9  ;;  %v402_v12 = vld [vmem:[#allocation10 + $0x40] sm:$0xff]  ;;  %v403_v13 = vld [vmem:[#allocation10 + $0x48] sm:$0xff]  ;;  %v404_v15 = vld [vmem:[#allocation10 + $0x50] sm:$0xff] }
  0x7d   :  { %847 = vmatpush3.bf16.msra.mxu1 %v846_v20  ;;  %866 = vmatprep.subr.bf16.mxu0 %v1116_v0  ;;  %v897_v14 = vpack.c.bf16 %v403_v13, %v402_v12  ;;  %v405_v16 = vld [vmem:[#allocation10 + $0x58] sm:$0xff]  ;;  %v406_v18 = vld [vmem:[#allocation10 + $0x60] sm:$0xff]  ;;  %v407_v19 = vld [vmem:[#allocation10 + $0x68] sm:$0xff] }
  0x7e   :  { %848 = vmatprep.subr.bf16.mxu1 %v1116_v0  ;;  %v900_v17 = vpack.c.bf16 %v405_v16, %v404_v15  ;;  %v903_v20 = vpack.c.bf16 %v407_v19, %v406_v18  ;;  %v602_v21 = vld [vmem:[%s1342_s4] ss:$0 sm:$0xff]  ;;  %v489_v30 = vld [vmem:[#allocation11 + $0x8] sm:$0xff]  ;;  %v490_v31 = vld [vmem:[#allocation11 + $0x10] sm:$0xff] }
  0x7f   :  { %v409_v27 = vld [vmem:[#allocation10 + $0x78] sm:$0xff]  ;;  %v492_v35 = vld [vmem:[#allocation11 + $0x20] sm:$0xff]  ;;  %v493_v36 = vld [vmem:[#allocation11 + $0x28] sm:$0xff] }
  0x80   :  { %868 = vmatpush3.bf16.msra.mxu0 %v867_v41  ;;  %v491_v33 = vld [vmem:[#allocation11 + $0x18] sm:$0xff]  ;;  %v915_v37 = vpack.c.bf16 %v493_v36, %v492_v35  ;;  %v496_v40 = vld [vmem:[#allocation11 + $0x40] sm:$0xff]  ;;  %v497_v41 = vld [vmem:[#allocation11 + $0x48] sm:$0xff] }
  0x81   :  { %850 = vmatpush3.bf16.msra.mxu1 %v849_v23  ;;  %869 = vmatprep.subr.bf16.mxu0 %v1116_v0  ;;  %v912_v34 = vpack.c.bf16 %v491_v33, %v490_v31  ;;  %v495_v38 = vld [vmem:[#allocation11 + $0x38] sm:$0xff]  ;;  %v921_v42 = vpack.c.bf16 %v497_v41, %v496_v40  ;;  %v498_v43 = vld [vmem:[#allocation11 + $0x50] sm:$0xff]  ;;  %v500_v46 = vld [vmem:[#allocation11 + $0x60] sm:$0xff] }
  0x82   :  { %851 = vmatprep.subr.bf16.mxu1 %v1116_v0  ;;  %v603_v49 = vld [vmem:[%s1344_s6] ss:$0 sm:$0xff] }
  0x84   :  { %871 = vmatpush3.bf16.msra.mxu0 %v870_v44  ;;  %v499_v44 = vld [vmem:[#allocation11 + $0x58] sm:$0xff] }
  0x85   :  { %853 = vmatpush3.bf16.msra.mxu1 %v852_v26  ;;  %872 = vmatprep.subr.bf16.mxu0 %v1116_v0  ;;  %v408_v26 = vld [vmem:[#allocation10 + $0x70] sm:$0xff]  ;;  %v924_v45 = vpack.c.bf16 %v499_v44, %v498_v43 }
  0x86   :  { %854 = vmatprep.subr.bf16.mxu1 %v1116_v0  ;;  %v906_v28 = vpack.c.bf16 %v409_v27, %v408_v26 }
  0x88   :  { %874 = vmatpush3.bf16.msra.mxu0 %v873_v47  ;;  %v501_v47 = vld [vmem:[#allocation11 + $0x68] sm:$0xff] }
  0x89   :  { %856 = vmatpush3.bf16.msra.mxu1 %v855_v29  ;;  %875 = vmatprep.subr.bf16.mxu0 %v1116_v0  ;;  %v488_v29 = vld [vmem:[#allocation11] sm:$0xff]  ;;  %v927_v48 = vpack.c.bf16 %v501_v47, %v500_v46 }
  0x8a   :  { %857 = vmatprep.subr.bf16.mxu1 %v1116_v0 }
  0x8c   :  { %877 = vmatpush3.bf16.msra.mxu0 %v876_v50 }
  0x8d   :  { %859 = vmatpush3.bf16.msra.mxu1 %v858_v32  ;;  %878 = vmatprep.subr.bf16.mxu0 %v1116_v0  ;;  %v909_v32 = vpack.c.bf16 %v489_v30, %v488_v29 }
  0x8e   :  { %884 = vmatprep.subr.bf16.mxu1 %v1116_v0 }
  0x90   :  { %880 = vmatpush3.bf16.msra.mxu0 %v879_v53 }
  0x91   :  { %881 = vmatprep.subr.bf16.mxu0 %v1116_v0 }
  0x94   :  { %883 = vmatpush3.bf16.msra.mxu0 %v882_v61  ;;  %v605_v61 = vld [vmem:[%s1348_s10] ss:$0 sm:$0xff] }
  0x95   :  { %908 = vmatprep.subr.bf16.mxu0 %v1116_v0 }
 0x14a   :  { %v201_v55 = vpop.f32.mrb[0].mxu0 }
 0x14b   :  { %v202_v56 = vadd.f32 %v600_v54, %v201_v55  ;;  %v689_v57 = vpop.f32.mrb[1].mxu0  ;;  %v502_v54 = vld [vmem:[#allocation11 + $0x70] sm:$0xff]  ;;  %v503_v55 = vld [vmem:[#allocation11 + $0x78] sm:$0xff] }
 0x14c   :  { %v604_v57 = vld [vmem:[%s1346_s8] ss:$0 sm:$0xff] }
 0x14d   :  { %v205_v58 = vmax.f32 %v202_v56, 0.0  ;;  %v930_v56 = vpack.c.bf16 %v503_v55, %v502_v54 }
 0x14f   :  { %723 = vmatmul.mubr.f32.vlgmr.msra.gmra.mrb[0].mxu1 %v205_v58 }
 0x150   :  { %792 = vmatprep.mubr.msk.f32.mxu1 %vm1117_vm0, %v1118_v1  ;;  %886 = vmatpush3.bf16.msra.mxu1 %v885_v3 }
 0x151   :  { %887 = vmatprep.subr.bf16.mxu1 %v1116_v0 }
 0x154   :  { %889 = vmatpush3.bf16.msra.mxu1 %v888_v5 }
 0x155   :  { %890 = vmatprep.subr.bf16.mxu1 %v1116_v0 }
 0x158   :  { %892 = vmatpush3.bf16.msra.mxu1 %v891_v8 }
 0x159   :  { %893 = vmatprep.subr.bf16.mxu1 %v1116_v0 }
 0x15c   :  { %895 = vmatpush3.bf16.msra.mxu1 %v894_v11 }
 0x15d   :  { %896 = vmatprep.subr.bf16.mxu1 %v1116_v0 }
 0x160   :  { %898 = vmatpush3.bf16.msra.mxu1 %v897_v14 }
 0x161   :  { %899 = vmatprep.subr.bf16.mxu1 %v1116_v0 }
 0x164   :  { %901 = vmatpush3.bf16.msra.mxu1 %v900_v17 }
 0x165   :  { %902 = vmatprep.subr.bf16.mxu1 %v1116_v0 }
 0x168   :  { %904 = vmatpush3.bf16.msra.mxu1 %v903_v20 }
 0x169   :  { %905 = vmatprep.subr.bf16.mxu1 %v1116_v0 }
 0x16c   :  { %907 = vmatpush3.bf16.msra.mxu1 %v906_v28 }
 0x222   :  { %v295_v22 = vpop.f32.mrb[0].mxu1 }
 0x223   :  { %v296_v23 = vadd.f32 %v602_v21, %v295_v22  ;;  %v724_v24 = vpop.f32.mrb[1].mxu1 }
 0x225   :  { %v299_v25 = vmax.f32 %v296_v23, 0.0 }
 0x227   :  { %758 = vmatmul.mubr.f32.vlgmr.msra.gmra.mrb[2].mxu0 %v299_v25 }
 0x228   :  { %827 = vmatprep.mubr.msk.f32.mxu0 %vm1117_vm0, %v1118_v1  ;;  %910 = vmatpush3.bf16.msra.mxu0 %v909_v32  ;;  %v494_v1 = vld [vmem:[#allocation11 + $0x30] sm:$0xff] }
 0x229   :  { %911 = vmatprep.subr.bf16.mxu0 %v1116_v0  ;;  %v918_v39 = vpack.c.bf16 %v495_v38, %v494_v1 }
 0x22c   :  { %913 = vmatpush3.bf16.msra.mxu0 %v912_v34 }
 0x22d   :  { %914 = vmatprep.subr.bf16.mxu0 %v1116_v0 }
 0x230   :  { %916 = vmatpush3.bf16.msra.mxu0 %v915_v37 }
 0x231   :  { %917 = vmatprep.subr.bf16.mxu0 %v1116_v0 }
 0x234   :  { %919 = vmatpush3.bf16.msra.mxu0 %v918_v39 }
 0x235   :  { %920 = vmatprep.subr.bf16.mxu0 %v1116_v0 }
 0x238   :  { %922 = vmatpush3.bf16.msra.mxu0 %v921_v42 }
 0x239   :  { %923 = vmatprep.subr.bf16.mxu0 %v1116_v0 }
 0x23c   :  { %925 = vmatpush3.bf16.msra.mxu0 %v924_v45 }
 0x23d   :  { %926 = vmatprep.subr.bf16.mxu0 %v1116_v0 }
 0x240   :  { %928 = vmatpush3.bf16.msra.mxu0 %v927_v48 }
 0x241   :  { %929 = vmatprep.subr.bf16.mxu0 %v1116_v0 }
 0x244   :  { %931 = vmatpush3.bf16.msra.mxu0 %v930_v56 }
 0x2fa   :  { %v389_v50 = vpop.f32.mrb[2].mxu0 }
 0x2fb   :  { %v390_v51 = vadd.f32 %v603_v49, %v389_v50  ;;  %v759_v52 = vpop.f32.mrb[3].mxu0 }
 0x2fd   :  { %v393_v53 = vmax.f32 %v390_v51, 0.0 }
 0x2ff   :  { %793 = vmatmul.mubr.f32.vlgmr.msra.gmra.mrb[2].mxu1 %v393_v53 }
 0x3d2   :  { %v483_v58 = vpop.f32.mrb[2].mxu1 }
 0x3d3   :  { %v484_v59 = vadd.f32 %v604_v57, %v483_v58  ;;  %v794_v0 = vpop.f32.mrb[3].mxu1 }
 0x3d5   :  { %v487_v60 = vmax.f32 %v484_v59, 0.0 }
 0x3d7   :  { %828 = vmatmul.mubr.f32.vlgmr.msra.gmra.mrb[4].mxu0 %v487_v60 }
 0x4aa   :  { %v577_v62 = vpop.f32.mrb[4].mxu0 }
 0x4ab   :  { %v578_v63 = vadd.f32 %v605_v61, %v577_v62  ;;  %v829_v2 = vpop.f32.mrb[5].mxu0 }
 0x4ad   :  { %581 = vst [vmem:[#allocation13] sm:$0xff] %v578_v63 }
 0x4ae   :  { %1087 = shalt.err (!%p1084_p10)
}
 0x4af   :  { %s1088_s3 = scalar_lea.hbm %s1349_s11, 128 }
 0x4b0   :  { %p1089_p11 = scmp.ne.s32.totalorder %s1349_s11, %s1088_s3  ;;  %p1092_p12 = scmp.lt.u32.totalorder %s1088_s3, %s1349_s11 }
 0x4b2   :  { %p1094_p13 = pnand %p1092_p12, %p1089_p11 }
 0x4b4   :  { %1097 = shalt.err (!%p1094_p13)
}
 0x4b5   :  { %591 = dma.vmem_to_hbm [thread:$0]  %s589_s13, 128, %s1349_s11, [#allocation4]  }
 0x4b6   :  { %1106 = dma.done.wait [#allocation4], 128  }
 0x4b7   :  { %1107 = vsyncadd [#allocation4], 4294967168 }
 0x4b8   :  { %595 = vsyncpa [#allocation3], 1 }
 0x4b9   :  { %596 = vsyncpa [#allocation6], 1 }
 0x4ba   :  { %597 = vsyncpa [#allocation9], 1 }
 0x4bb   :  { %598 = vsyncpa [#allocation12], 1 }
 0x4bc   :  { %599 = vsyncpa [#allocation4], 1 }

</bundles_post_ra>
